<compile_context>
chip_gen: v5e
topology: v5e:2x2
jax: 0.10.0
libtpu: 0.0.40
codegen_flags: <defaults>
</compile_context>

<pallas_src>
import numpy as np
import jax
import jax.numpy as jnp
from jax.experimental import pallas as pl
from jax.experimental.pallas import tpu as pltpu

_EPS = 1e-5  # nn.LayerNorm default eps


# ------------------------------ helpers --------------------------------------


def _round_up(n, m):
    return ((n + m - 1) // m) * m


def _cdiv(a, b):
    return -(-a // b)


def _spec_resident(shape, index_map):
    """BlockSpec for a constant-index (VMEM-resident) operand: single-buffered."""
    buffered = getattr(pl, "Buffered", None)
    if buffered is not None:
        try:
            return pl.BlockSpec(shape, index_map, pipeline_mode=buffered(1))
        except TypeError:  # older BlockSpec signature without pipeline_mode
            pass
    return pl.BlockSpec(shape, index_map)


def _norms(x, ln):
    """LayerNorm1 + Identity-mixer residual, then LayerNorm2.  f32 in / f32 out."""
    g1, b1 = ln[0:1, :], ln[1:2, :]
    g2, b2 = ln[2:3, :], ln[3:4, :]

    mu1 = jnp.mean(x, axis=-1, keepdims=True)
    xc = x - mu1
    var1 = jnp.mean(xc * xc, axis=-1, keepdims=True)
    h = x + (xc * jax.lax.rsqrt(var1 + _EPS) * g1 + b1)     # x + LN1(x)

    mu2 = jnp.mean(h, axis=-1, keepdims=True)
    hc = h - mu2
    var2 = jnp.mean(hc * hc, axis=-1, keepdims=True)
    y2 = hc * jax.lax.rsqrt(var2 + _EPS) * g2 + b2          # LN2(h)
    return h, y2


# ------------------------------ kernels ---------------------------------------


def _mf_kernel_simple(x_ref, ln_ref, w1_ref, w2_ref, sb_ref, o_ref):
    """One (TM, D) row tile; full (D,4D)/(4D,D) weights VMEM-resident."""
    x = x_ref[...].astype(jnp.float32)                       # (TM, D)
    h, y2 = _norms(x, ln_ref[...])

    # fc1 -> StarReLU -> fc2 fused: u and the bf16 activation are not co-live.
    u = jnp.dot(y2.astype(jnp.bfloat16), w1_ref[...],
                preferred_element_type=jnp.float32)          # (TM, 4D) f32
    r = jnp.maximum(u, 0.0)
    a = (sb_ref[0] * (r * r) + sb_ref[1]).astype(jnp.bfloat16)
    v = jnp.dot(a, w2_ref[...], preferred_element_type=jnp.float32)  # (TM, D)

    o_ref[...] = (h + v).astype(o_ref.dtype)


def _mf_kernel_htiled(x_ref, ln_ref, w1_ref, w2_ref, sb_ref, o_ref,
                      h_ref, y2_ref, acc_ref):
    """Hidden-dim-tiled variant: grid=(rows, hidden_chunks), hidden axis last."""
    j = pl.program_id(1)

    @pl.when(j == 0)
    def _():
        x = x_ref[...].astype(jnp.float32)                   # (TM, D)
        h, y2 = _norms(x, ln_ref[...])
        h_ref[...] = h
        y2_ref[...] = y2.astype(jnp.bfloat16)
        acc_ref[...] = jnp.zeros_like(acc_ref)

    # Partial fc1 -> StarReLU -> partial fc2 for this hidden chunk.
    u = jnp.dot(y2_ref[...], w1_ref[...],
                preferred_element_type=jnp.float32)          # (TM, TH) f32
    r = jnp.maximum(u, 0.0)
    a = (sb_ref[0] * (r * r) + sb_ref[1]).astype(jnp.bfloat16)
    acc_ref[...] += jnp.dot(a, w2_ref[...],
                            preferred_element_type=jnp.float32)  # (TM, D)

    @pl.when(j == pl.num_programs(1) - 1)
    def _():
        o_ref[...] = (h_ref[...] + acc_ref[...]).astype(o_ref.dtype)


# ----------------------------- tiling / VMEM ----------------------------------


def _choose_tm(M, block_rows):
    """Row tile: large, but keep >= 2 grid steps so both v7x TensorCores work."""
    n_tiles = max(1, _cdiv(M, block_rows))
    tm = _round_up(_cdiv(M, n_tiles), 8)
    if n_tiles < 2 and M > 8:
        tm = _round_up(_cdiv(M, 2), 8)
    return tm


def _choose_th(H4, block_hidden):
    """Hidden-dim chunk; must evenly divide H4 and be lane-aligned, else full."""
    if H4 <= block_hidden:
        return H4
    n = _cdiv(H4, block_hidden)
    th = _round_up(_cdiv(H4, n), 128)
    if H4 % th != 0:
        return H4            # fall back to fully-resident weights
    return th


def _vmem_limit_bytes(TM, D, H4, TH, n_h, io_bytes):
    w_bufs = 1 if n_h == 1 else 2                   # Buffered(1) when resident
    weights = 2 * D * TH * 2 * w_bufs               # fc1 + fc2 blocks, bf16
    ln = 4 * D * 4
    io = 2 * (TM * D * io_bytes) * 2                # x + out tiles, double-buffered
    inter = TM * TH * (4 + 2)                       # u (f32) + bf16 StarReLU operand
    scratch = 0 if n_h == 1 else TM * D * (4 + 2 + 4)   # h, y2(bf16), acc
    est = weights + ln + io + inter + scratch
    # explicit limit: v5e default is only 16 MiB; cap at 64 MiB (v7x physical).
    return max(min(int(est * 1.25) + (4 << 20), 64 << 20), 16 << 20)


# ----------------------------- parameter prep ---------------------------------


def prepare_params(gamma1, beta1, gamma2, beta2, fc1_w, fc2_w,
                   star_scale, star_bias):
    """One-time weight prep (transpose + bf16 cast + LN stack).  Hoist out of the
    per-step path: these are O(8*D^2)-byte HBM ops if redone every forward."""
    ln = jnp.stack([gamma1, beta1, gamma2, beta2]).astype(jnp.float32)   # (4, D)
    w1t = jnp.asarray(fc1_w).T.astype(jnp.bfloat16)                      # (D, 4D)
    w2t = jnp.asarray(fc2_w).T.astype(jnp.bfloat16)                      # (4D, D)
    sb = jnp.stack([jnp.asarray(star_scale, jnp.float32).reshape(()),
                    jnp.asarray(star_bias, jnp.float32).reshape(())])    # (2,)
    return ln, w1t, w2t, sb


# ------------------------------ main wrapper ----------------------------------


def metaformer_block_apply(x, params, *, block_rows=512, block_hidden=2048):
    """Forward pass of MetaFormerBlock (Identity mixer, Mlp, LayerNorm defaults).

    x      : (..., D) channels-last tokens, e.g. (B, H, W, D) or (B, N, D)
    params : output of prepare_params(...)
    """
    ln_params, w1t, w2t, sb = params
    orig_shape = x.shape
    D = orig_shape[-1]
    H4 = w1t.shape[1]
    assert w1t.shape == (D, H4) and w2t.shape == (H4, D)
    out_dtype = x.dtype

    xm = x.reshape(-1, D)
    M = xm.shape[0]

    TM = _choose_tm(M, block_rows)
    M_pad = _round_up(M, TM)
    if M_pad != M:
        xm = jnp.pad(xm, ((0, M_pad - M), (0, 0)))   # padded rows sliced off below

    TH = _choose_th(H4, block_hidden)
    n_h = H4 // TH
    io_bytes = jnp.dtype(xm.dtype).itemsize
    vmem_limit = _vmem_limit_bytes(TM, D, H4, TH, n_h, io_bytes)

    if n_h == 1:
        kernel = _mf_kernel_simple
        grid = (M_pad // TM,)
        in_specs = [
            pl.BlockSpec((TM, D), lambda i: (i, 0)),                   # x row tile
            _spec_resident((4, D), lambda i: (0, 0)),                  # LN params
            _spec_resident((D, H4), lambda i: (0, 0)),                 # fc1.weight^T
            _spec_resident((H4, D), lambda i: (0, 0)),                 # fc2.weight^T
            pl.BlockSpec(memory_space=pltpu.MemorySpace.SMEM),         # StarReLU s,b
        ]
        out_specs = pl.BlockSpec((TM, D), lambda i: (i, 0))
        scratch_shapes = []
        dim_sem = ("parallel",)
    else:
        kernel = _mf_kernel_htiled
        grid = (M_pad // TM, n_h)                                      # hidden last
        in_specs = [
            pl.BlockSpec((TM, D), lambda i, j: (i, 0)),                # x row tile
            _spec_resident((4, D), lambda i, j: (0, 0)),               # LN params
            pl.BlockSpec((D, TH), lambda i, j: (0, j)),                # fc1 chunk
            pl.BlockSpec((TH, D), lambda i, j: (j, 0)),                # fc2 chunk
            pl.BlockSpec(memory_space=pltpu.MemorySpace.SMEM),         # StarReLU s,b
        ]
        out_specs = pl.BlockSpec((TM, D), lambda i, j: (i, 0))
        scratch_shapes = [
            pltpu.VMEM((TM, D), jnp.float32),    # h stash
            pltpu.VMEM((TM, D), jnp.bfloat16),   # LN2 output stash (fc1 operand)
            pltpu.VMEM((TM, D), jnp.float32),    # fc2 accumulator
        ]
        dim_sem = ("parallel", "arbitrary")

    out = pl.pallas_call(
        kernel,
        out_shape=jax.ShapeDtypeStruct((M_pad, D), out_dtype),
        grid_spec=pltpu.PrefetchScalarGridSpec(
            num_scalar_prefetch=0,
            grid=grid,
            in_specs=in_specs,
            out_specs=out_specs,
            scratch_shapes=scratch_shapes,
        ),
        compiler_params=pltpu.CompilerParams(
            dimension_semantics=dim_sem,
            vmem_limit_bytes=vmem_limit,
        ),
    )(xm, ln_params, w1t, w2t, sb)

    if M_pad != M:
        out = out[:M]
    return out.reshape(orig_shape)


def metaformer_block(x, gamma1, beta1, gamma2, beta2, fc1_w, fc2_w,
                     star_scale, star_bias, *, block_rows=512, block_hidden=2048):
    """Convenience wrapper (does per-call weight prep; for production, call
    prepare_params once and reuse metaformer_block_apply)."""
    params = prepare_params(gamma1, beta1, gamma2, beta2, fc1_w, fc2_w,
                            star_scale, star_bias)
    return metaformer_block_apply(x, params, block_rows=block_rows,
                                  block_hidden=block_hidden)


# -------------------------------- reference -----------------------------------


def _reference(x, gamma1, beta1, gamma2, beta2, fc1_w, fc2_w, s, b, eps=_EPS):
    def ln(t, g, be):
        mu = jnp.mean(t, axis=-1, keepdims=True)
        var = jnp.mean((t - mu) ** 2, axis=-1, keepdims=True)
        return (t - mu) / jnp.sqrt(var + eps) * g + be
    h = x + ln(x, gamma1, beta1)                   # Identity token mixer branch
    y = ln(h, gamma2, beta2)
    u = y @ fc1_w.T
    a = s * jnp.maximum(u, 0.0) ** 2 + b           # StarReLU
    v = a @ fc2_w.T
    return h + v


# --------------------------------- demo ----------------------------------------


if __name__ == "__main__":
    # batch=2, 8x8 spatial tokens, dim=32 -> Mlp hidden = 4*32 = 128
    B, Hs, Ws, D = 2, 8, 8, 32
    H4 = 4 * D

    key = jax.random.PRNGKey(0)
    ks = jax.random.split(key, 7)
    x = jax.random.normal(ks[0], (B, Hs, Ws, D), jnp.float32)
    gamma1 = 1.0 + 0.1 * jax.random.normal(ks[1], (D,), jnp.float32)
    beta1 = 0.1 * jax.random.normal(ks[2], (D,), jnp.float32)
    gamma2 = 1.0 + 0.1 * jax.random.normal(ks[3], (D,), jnp.float32)
    beta2 = 0.1 * jax.random.normal(ks[4], (D,), jnp.float32)
    fc1_w = jax.random.normal(ks[5], (H4, D), jnp.float32) / np.sqrt(D)   # (4D, D)
    fc2_w = jax.random.normal(ks[6], (D, H4), jnp.float32) / np.sqrt(H4)  # (D, 4D)
    star_scale = jnp.float32(1.0)   # StarReLU learnable scale (init value)
    star_bias = jnp.float32(0.0)    # StarReLU learnable bias  (init value)

    # TODO(synk): Dropout / DropPath / LayerScale / ResScale are identity under the
    # module's default args (drop=0, drop_path=0, *_scale_init_value=None) and are
    # folded away; a non-default token_mixer module is not fused into this kernel.
    # TODO(synk): for memory-bound small-D deployments, pass bf16 x (and read bf16
    # out) to halve HBM traffic; the demo keeps f32 I/O for a tight reference check.

    params = prepare_params(gamma1, beta1, gamma2, beta2, fc1_w, fc2_w,
                            star_scale, star_bias)   # one-time weight prep

    y = jax.block_until_ready(metaformer_block_apply(x, params))

    ref = _reference(x, gamma1, beta1, gamma2, beta2, fc1_w, fc2_w,
                     star_scale, star_bias)

    assert y.shape == x.shape and y.dtype == x.dtype
    # bf16 matmul operands with f32 accumulation -> loose-but-meaningful tolerance
    np.testing.assert_allclose(np.asarray(y), np.asarray(ref), atol=5e-2, rtol=5e-2)

    # Also exercise the hidden-dim-tiled path (block_hidden < H4 forces 2 chunks).
    y2 = jax.block_until_ready(
        metaformer_block_apply(x, params, block_hidden=64))
    np.testing.assert_allclose(np.asarray(y2), np.asarray(ref), atol=5e-2, rtol=5e-2)

    print("KERNEL_OK")
</pallas_src>

<mosaic_0001>
module attributes {stable_mosaic.version = 11 : i64} {
  func.func @_mf_kernel_simple(%arg0: i32, %arg1: memref<64x32xf32, #tpu.memory_space<vmem>>, %arg2: memref<4x32xf32, #tpu.memory_space<vmem>>, %arg3: memref<32x128xbf16, #tpu.memory_space<vmem>>, %arg4: memref<128x32xbf16, #tpu.memory_space<vmem>>, %arg5: memref<2xf32, #tpu.memory_space<smem>>, %arg6: memref<64x32xf32, #tpu.memory_space<vmem>>) attributes {dimension_semantics = [#tpu.dimension_semantics<parallel>], iteration_bounds = array<i64: 2>, scalar_prefetch = 0 : i64, scratch_operands = 0 : i64, tpu.core_type = #tpu.core_type<tc>, window_params = [{transform_indices = @transform_0, window_bounds = array<i64: 64, 32>}, {pipeline_mode = #tpu.pipeline_mode<synchronous>, transform_indices = @transform_1, window_bounds = array<i64: 4, 32>}, {pipeline_mode = #tpu.pipeline_mode<synchronous>, transform_indices = @transform_2, window_bounds = array<i64: 32, 128>}, {pipeline_mode = #tpu.pipeline_mode<synchronous>, transform_indices = @transform_3, window_bounds = array<i64: 128, 32>}, {transform_indices = @transform_4, window_bounds = array<i64: 2>}, {transform_indices = @transform_5, window_bounds = array<i64: 64, 32>}]} {
    %c0 = arith.constant 0 : index
    %c0_0 = arith.constant 0 : index
    %0 = vector.load %arg1[%c0, %c0_0] : memref<64x32xf32, #tpu.memory_space<vmem>>, vector<64x32xf32>
    %c0_1 = arith.constant 0 : index
    %c0_2 = arith.constant 0 : index
    %1 = vector.load %arg2[%c0_1, %c0_2] : memref<4x32xf32, #tpu.memory_space<vmem>>, vector<4x32xf32>
    %2 = vector.extract_strided_slice %1 {offsets = [0, 0], sizes = [1, 32], strides = [1, 1]} : vector<4x32xf32> to vector<1x32xf32>
    %3 = vector.extract_strided_slice %1 {offsets = [1, 0], sizes = [1, 32], strides = [1, 1]} : vector<4x32xf32> to vector<1x32xf32>
    %4 = vector.extract_strided_slice %1 {offsets = [2, 0], sizes = [1, 32], strides = [1, 1]} : vector<4x32xf32> to vector<1x32xf32>
    %5 = vector.extract_strided_slice %1 {offsets = [3, 0], sizes = [1, 32], strides = [1, 1]} : vector<4x32xf32> to vector<1x32xf32>
    %cst = arith.constant dense<0.000000e+00> : vector<64xf32>
    %6 = vector.multi_reduction <add>, %0, %cst [1] : vector<64x32xf32> to vector<64xf32>
    %7 = vector.shape_cast %6 : vector<64xf32> to vector<64x1xf32>
    %cst_3 = arith.constant 3.200000e+01 : f32
    %8 = vector.broadcast %cst_3 : f32 to vector<64x1xf32>
    %9 = arith.divf %7, %8 : vector<64x1xf32>
    %10 = vector.broadcast %9 : vector<64x1xf32> to vector<64x32xf32>
    %11 = arith.subf %0, %10 : vector<64x32xf32>
    %12 = arith.mulf %11, %11 : vector<64x32xf32>
    %cst_4 = arith.constant dense<0.000000e+00> : vector<64xf32>
    %13 = vector.multi_reduction <add>, %12, %cst_4 [1] : vector<64x32xf32> to vector<64xf32>
    %14 = vector.shape_cast %13 : vector<64xf32> to vector<64x1xf32>
    %cst_5 = arith.constant 3.200000e+01 : f32
    %15 = vector.broadcast %cst_5 : f32 to vector<64x1xf32>
    %16 = arith.divf %14, %15 : vector<64x1xf32>
    %cst_6 = arith.constant 9.99999974E-6 : f32
    %17 = vector.broadcast %cst_6 : f32 to vector<64x1xf32>
    %18 = arith.addf %16, %17 : vector<64x1xf32>
    %19 = math.rsqrt %18 : vector<64x1xf32>
    %20 = vector.broadcast %19 : vector<64x1xf32> to vector<64x32xf32>
    %21 = arith.mulf %11, %20 : vector<64x32xf32>
    %22 = vector.broadcast %2 : vector<1x32xf32> to vector<64x32xf32>
    %23 = arith.mulf %21, %22 : vector<64x32xf32>
    %24 = vector.broadcast %3 : vector<1x32xf32> to vector<64x32xf32>
    %25 = arith.addf %23, %24 : vector<64x32xf32>
    %26 = arith.addf %0, %25 : vector<64x32xf32>
    %cst_7 = arith.constant dense<0.000000e+00> : vector<64xf32>
    %27 = vector.multi_reduction <add>, %26, %cst_7 [1] : vector<64x32xf32> to vector<64xf32>
    %28 = vector.shape_cast %27 : vector<64xf32> to vector<64x1xf32>
    %cst_8 = arith.constant 3.200000e+01 : f32
    %29 = vector.broadcast %cst_8 : f32 to vector<64x1xf32>
    %30 = arith.divf %28, %29 : vector<64x1xf32>
    %31 = vector.broadcast %30 : vector<64x1xf32> to vector<64x32xf32>
    %32 = arith.subf %26, %31 : vector<64x32xf32>
    %33 = arith.mulf %32, %32 : vector<64x32xf32>
    %cst_9 = arith.constant dense<0.000000e+00> : vector<64xf32>
    %34 = vector.multi_reduction <add>, %33, %cst_9 [1] : vector<64x32xf32> to vector<64xf32>
    %35 = vector.shape_cast %34 : vector<64xf32> to vector<64x1xf32>
    %cst_10 = arith.constant 3.200000e+01 : f32
    %36 = vector.broadcast %cst_10 : f32 to vector<64x1xf32>
    %37 = arith.divf %35, %36 : vector<64x1xf32>
    %cst_11 = arith.constant 9.99999974E-6 : f32
    %38 = vector.broadcast %cst_11 : f32 to vector<64x1xf32>
    %39 = arith.addf %37, %38 : vector<64x1xf32>
    %40 = math.rsqrt %39 : vector<64x1xf32>
    %41 = vector.broadcast %40 : vector<64x1xf32> to vector<64x32xf32>
    %42 = arith.mulf %32, %41 : vector<64x32xf32>
    %43 = vector.broadcast %4 : vector<1x32xf32> to vector<64x32xf32>
    %44 = arith.mulf %42, %43 : vector<64x32xf32>
    %45 = vector.broadcast %5 : vector<1x32xf32> to vector<64x32xf32>
    %46 = arith.addf %44, %45 : vector<64x32xf32>
    %47 = arith.truncf %46 : vector<64x32xf32> to vector<64x32xbf16>
    %c0_12 = arith.constant 0 : index
    %c0_13 = arith.constant 0 : index
    %48 = vector.load %arg3[%c0_12, %c0_13] : memref<32x128xbf16, #tpu.memory_space<vmem>>, vector<32x128xbf16>
    %cst_14 = arith.constant dense<0.000000e+00> : vector<64x128xf32>
    %49 = tpu.matmul %47, %48, %cst_14 {dimension_numbers = #tpu.dot_dimension_numbers<[1], [0], [0], [1], [0, 0, 1, 1], [], []>} : vector<64x32xbf16>, vector<32x128xbf16>, vector<64x128xf32> -> vector<64x128xf32>
    %cst_15 = arith.constant 0.000000e+00 : f32
    %50 = vector.broadcast %cst_15 : f32 to vector<64x128xf32>
    %51 = arith.maximumf %49, %50 : vector<64x128xf32>
    %c0_16 = arith.constant 0 : index
    %52 = memref.load %arg5[%c0_16] : memref<2xf32, #tpu.memory_space<smem>>
    %53 = arith.mulf %51, %51 : vector<64x128xf32>
    %54 = vector.broadcast %52 : f32 to vector<64x128xf32>
    %55 = arith.mulf %54, %53 : vector<64x128xf32>
    %c1 = arith.constant 1 : index
    %56 = memref.load %arg5[%c1] : memref<2xf32, #tpu.memory_space<smem>>
    %57 = vector.broadcast %56 : f32 to vector<64x128xf32>
    %58 = arith.addf %55, %57 : vector<64x128xf32>
    %59 = arith.truncf %58 : vector<64x128xf32> to vector<64x128xbf16>
    %c0_17 = arith.constant 0 : index
    %c0_18 = arith.constant 0 : index
    %60 = vector.load %arg4[%c0_17, %c0_18] : memref<128x32xbf16, #tpu.memory_space<vmem>>, vector<128x32xbf16>
    %cst_19 = arith.constant dense<0.000000e+00> : vector<64x32xf32>
    %61 = tpu.matmul %59, %60, %cst_19 {dimension_numbers = #tpu.dot_dimension_numbers<[1], [0], [0], [1], [0, 0, 1, 1], [], []>} : vector<64x128xbf16>, vector<128x32xbf16>, vector<64x32xf32> -> vector<64x32xf32>
    %62 = arith.addf %26, %61 : vector<64x32xf32>
    %c0_20 = arith.constant 0 : index
    %c0_21 = arith.constant 0 : index
    %63 = vector.load %arg6[%c0_20, %c0_21] : memref<64x32xf32, #tpu.memory_space<vmem>>, vector<64x32xf32>
    tpu.vector_store %arg6[%c0_20, %c0_21], %62 {strides = array<i32>} : memref<64x32xf32, #tpu.memory_space<vmem>>, vector<64x32xf32>,
    return
  }
  func.func @transform_0(%arg0: i32) -> (i32, i32) {
    %c0_i32 = arith.constant 0 : i32
    %c0_i32_0 = arith.constant 0 : i32
    return %arg0, %c0_i32 : i32, i32
  }
  func.func @transform_1(%arg0: i32) -> (i32, i32) {
    %c0_i32 = arith.constant 0 : i32
    %c0_i32_0 = arith.constant 0 : i32
    %c0_i32_1 = arith.constant 0 : i32
    return %c0_i32, %c0_i32_0 : i32, i32
  }
  func.func @transform_2(%arg0: i32) -> (i32, i32) {
    %c0_i32 = arith.constant 0 : i32
    %c0_i32_0 = arith.constant 0 : i32
    %c0_i32_1 = arith.constant 0 : i32
    return %c0_i32, %c0_i32_0 : i32, i32
  }
  func.func @transform_3(%arg0: i32) -> (i32, i32) {
    %c0_i32 = arith.constant 0 : i32
    %c0_i32_0 = arith.constant 0 : i32
    %c0_i32_1 = arith.constant 0 : i32
    return %c0_i32, %c0_i32_0 : i32, i32
  }
  func.func @transform_4(%arg0: i32) -> i32 {
    %c0_i32 = arith.constant 0 : i32
    %c0_i32_0 = arith.constant 0 : i32
    return %c0_i32 : i32
  }
  func.func @transform_5(%arg0: i32) -> (i32, i32) {
    %c0_i32 = arith.constant 0 : i32
    %c0_i32_0 = arith.constant 0 : i32
    return %arg0, %c0_i32 : i32, i32
  }
}

</mosaic_0001>

<bundles_post_ra>
// kernel: tpu_custom_call.1
= control target key start
LH: loop header
LB: loop body
LE: loop exit
PB: predicated region body
PF: predicated region fallthrough
CT: control target
= control target key end

     0   :  { %10 = vsyncpa [#allocation3], 0  ;;  %s1133_s18 = smov 0   ;;  %s1593_s0 = inlined_call_operand.vmem [shape: f32[128,32], index: 0, kind: input, shape index: {}]   ;;  %s1594_s1 = inlined_call_operand.vmem [shape: f32[4,32], index: 1, kind: input, shape index: {}]   ;;  %s1595_s2 = inlined_call_operand.vmem [shape: bf16[32,128], index: 2, kind: input, shape index: {}]   ;;  %s1596_s3 = inlined_call_operand.vmem [shape: bf16[128,32], index: 3, kind: input, shape index: {}]   ;;  %s1597_s4 = inlined_call_operand.vmem [shape: f32[2], index: 4, kind: input, shape index: {}]   ;;  %s1598_s5 = inlined_call_operand.vmem [shape: f32[128,32], index: 5, kind: output, shape index: {}]  }
   0x1 LB: > { %s934_s19 = sadd.s32 4294967295, %s1099_s18   ;;  %p936_p0 = scmp.ge.s32.totalorder %s1099_s18, 1  ;;  %s1099_s18 = sphi %s1133_s18, %s16_s18  }
   0x2   : > { %p157_p1 = scmp.lt.s32.totalorder %s1099_s18, 3  ;;  %s178_s22 = sshll.u32 %s1597_s4, 4  ;;  %s179_s22 = int_to_ptr.vmem [resolvable:$true] %s178_s22 }
   0x3   : > { %p1028_p3 = scmp.eq.s32.totalorder %s934_s19, 0  ;;  %s1101_s23 = smov [#allocation2]  }
   0x4   : > { %p158_p2 = pnand %p936_p0, %p157_p1 }
   0x6   : > { %p1024_p4 = pneg %p158_p2  ;;  %200 = sbr.rel (%p158_p2) target bundleno = 896 (0x380), region = 40 }
   0x8   : > { %p1025_p5 = pnand %p1028_p3, %p1024_p4 }
   0xa   : > { %1027 = dma.vmem_to_smem (!%p1025_p5), %s179_s22, 16, %s1101_s23, [#allocation3]  }
   0xb   : > { %1094 = dma.done.wait (%p1028_p3), [#allocation3], 16  }
   0xc   : > { %1096 = vsyncadd (%p1028_p3), [#allocation3], 4294967280 }
   0xd   : > { %207 = sfence }
   0xe   : > { %s941_s24 = sshll.u32 %s934_s19, 3  ;;  %vm252_vm0 = vcmask 261120   ;;  %v1102_v16 = vmov 32.0   ;;  %s725_s29 = sld [smem:[#allocation2]] }
   0xf   : > { %p231_p6 = scmp.lt.s32.totalorder %s941_s24, 15  ;;  %1040 = vrcp.f32 %v1102_v16  ;;  %s957_s30 = sld [smem:[#allocation2 + $0x1]] }
  0x11   : > { %s1612_s24 = smov (!%p231_p6, %s941_s24), 15 }
  0x12   : > { %s942_s25 = sshll.u32 %s1612_s24, 3 }
  0x13   : > { %s234_s28 = scalar_lea.vmem %s1593_s0, %s942_s25  ;;  %s240_s8 = scalar_lea.vmem %s1598_s5, %s942_s25 }
  0x14   : > { %v1152_v0 = vld [vmem:[%s234_s28 + $0x30] sm:$0xff]  ;;  %v1154_v1 = vld [vmem:[%s234_s28 + $0x20] sm:$0xff]  ;;  %v1164_v6 = vld [vmem:[%s234_s28 + $0x38] sm:$0xff] }
  0x15   : > { %v1156_v2 = vld [vmem:[%s234_s28 + $0x10] sm:$0xff]  ;;  %v271_v3 = vsel %vm252_vm0, %v1152_v0, 0.0  ;;  %v265_v4 = vsel %vm252_vm0, %v1154_v1, 0.0  ;;  %v1166_v7 = vld [vmem:[%s234_s28 + $0x28] sm:$0xff]  ;;  %v1168_v8 = vld [vmem:[%s234_s28 + $0x18] sm:$0xff]  ;;  %v274_v9 = vsel %vm252_vm0, %v1164_v6, 0.0  ;;  %v1041_v17 = vpop.eup %1040 }
  0x16   : > { %v259_v5 = vsel %vm252_vm0, %v1156_v2, 0.0  ;;  %272 = vadd.xlane.f32.xlu2 %v271_v3  ;;  %266 = vadd.xlane.f32.xlu1 %v265_v4  ;;  %v268_v10 = vsel %vm252_vm0, %v1166_v7, 0.0  ;;  %v262_v11 = vsel %vm252_vm0, %v1168_v8, 0.0  ;;  %v1176_v12 = vld [vmem:[%s234_s28 + $0x8] sm:$0xff]  ;;  %v1178_v13 = vld [vmem:[%s234_s28] sm:$0xff]  ;;  %v278_v18 = vmul.f32 32.0, %v1041_v17 }
  0x17   : > { %260 = vadd.xlane.f32.xlu0 %v259_v5  ;;  %v256_v14 = vsel %vm252_vm0, %v1176_v12, 0.0  ;;  %v253_v15 = vsel %vm252_vm0, %v1178_v13, 0.0  ;;  %vm282_vm1 = vweird.f32 %v1041_v17 }
  0x18   : > { %v279_v19 = vsub.f32 1.0, %v278_v18 }
  0x1a   : > { %v280_v20 = vmul.f32 %v1041_v17, %v279_v19 }
  0x1c   : > { %v281_v21 = vadd.f32 %v1041_v17, %v280_v20 }
  0x1e   : > { %275 = vadd.xlane.f32.xlu2 %v274_v9  ;;  %269 = vadd.xlane.f32.xlu1 %v268_v10  ;;  %v1184_v22 = vsel %vm282_vm1, %v1041_v17, %v281_v21 }
  0x1f   : > { %263 = vadd.xlane.f32.xlu0 %v262_v11 }
  0x26   : > { %257 = vadd.xlane.f32.xlu1 %v256_v14 }
  0x27   : > { %254 = vadd.xlane.f32.xlu0 %v253_v15 }
  0x89   : > { %v273_v23 = vpop.xlane.xlu2 %272  ;;  %v267_v24 = vpop.xlane.xlu1 %266 }
  0x8a   : > { %v288_v25 = vmul.f32 %v1184_v22, %v267_v24  ;;  %v261_v26 = vpop.xlane.xlu0 %260  ;;  %v290_v39 = vmul.f32 %v1184_v22, %v273_v23 }
  0x8b   : > { %v286_v27 = vmul.f32 %v1184_v22, %v261_v26 }
  0x8c   : > { %v1189_v28 = vsub.f32 %v1154_v1, %v288_v25  ;;  %v1218_v46 = vsub.f32 %v1152_v0, %v290_v39 }
  0x8d   : > { %v1192_v29 = vsub.f32 %v1156_v2, %v286_v27 }
  0x8e   : > { %v304_v30 = vmul.f32 %v1189_v28, %v1189_v28  ;;  %v306_v55 = vmul.f32 %v1218_v46, %v1218_v46 }
  0x8f   : > { %v302_v31 = vmul.f32 %v1192_v29, %v1192_v29 }
  0x90   : > { %v320_v32 = vsel %vm252_vm0, %v304_v30, 0.0  ;;  %v326_v58 = vsel %vm252_vm0, %v306_v55, 0.0 }
  0x91   : > { %v276_v33 = vpop.xlane.xlu2 %275  ;;  %v270_v34 = vpop.xlane.xlu1 %269  ;;  %v314_v35 = vsel %vm252_vm0, %v302_v31, 0.0  ;;  %321 = vadd.xlane.f32.xlu1 %v320_v32  ;;  %v1253_v32 = vld [vmem:[%s1594_s1] sm:$0xf] }
  0x92   : > { %v291_v36 = vmul.f32 %v1184_v22, %v276_v33  ;;  %v289_v37 = vmul.f32 %v1184_v22, %v270_v34  ;;  %315 = vadd.xlane.f32.xlu2 %v314_v35  ;;  %v264_v38 = vpop.xlane.xlu0 %263 }
  0x93   : > { %v287_v40 = vmul.f32 %v1184_v22, %v264_v38 }
  0x94   : > { %v1205_v41 = vsub.f32 %v1164_v6, %v291_v36  ;;  %v1208_v42 = vsub.f32 %v1166_v7, %v289_v37 }
  0x95   : > { %v1211_v43 = vsub.f32 %v1168_v8, %v287_v40 }
  0x96   : > { %v305_v44 = vmul.f32 %v1208_v42, %v1208_v42  ;;  %v307_v45 = vmul.f32 %v1205_v41, %v1205_v41 }
  0x97   : > { %v303_v47 = vmul.f32 %v1211_v43, %v1211_v43 }
  0x98   : > { %v323_v48 = vsel %vm252_vm0, %v305_v44, 0.0  ;;  %v329_v49 = vsel %vm252_vm0, %v307_v45, 0.0  ;;  %v1262_v45 = vperm.slane %v1253_v32, 0 }
  0x99   : > { %330 = vadd.xlane.f32.xlu1 %v329_v49  ;;  %v317_v50 = vsel %vm252_vm0, %v303_v47, 0.0  ;;  %v258_v51 = vpop.xlane.xlu1 %257  ;;  %v1265_v47 = vperm.slane %v1253_v32, 1 }
  0x9a   : > { %324 = vadd.xlane.f32.xlu2 %v323_v48  ;;  %318 = vadd.xlane.f32.xlu0 %v317_v50  ;;  %v255_v52 = vpop.xlane.xlu0 %254  ;;  %v285_v54 = vmul.f32 %v1184_v22, %v258_v51 }
  0x9b   : > { %v284_v53 = vmul.f32 %v1184_v22, %v255_v52 }
  0x9c   : > { %v1233_v57 = vsub.f32 %v1176_v12, %v285_v54 }
  0x9d   : > { %v1230_v56 = vsub.f32 %v1178_v13, %v284_v53 }
  0x9e   : > { %v301_v61 = vmul.f32 %v1233_v57, %v1233_v57 }
  0x9f   : > { %v300_v59 = vmul.f32 %v1230_v56, %v1230_v56 }
  0xa0   : > { %v311_v62 = vsel %vm252_vm0, %v301_v61, 0.0 }
  0xa1   : > { %v308_v60 = vsel %vm252_vm0, %v300_v59, 0.0 }
  0xa2   : > { %327 = vadd.xlane.f32.xlu0 %v326_v58  ;;  %309 = vadd.xlane.f32.xlu2 %v308_v60 }
  0xaa   : > { %312 = vadd.xlane.f32.xlu0 %v311_v62 }
 0x104   : > { %v322_v63 = vpop.xlane.xlu1 %321 }
 0x105   : > { %v316_v3 = vpop.xlane.xlu2 %315  ;;  %v336_v4 = vmul.f32 %v322_v63, %v1184_v22 }
 0x106   : > { %v334_v5 = vmul.f32 %v316_v3, %v1184_v22 }
 0x107   : > { %v344_v9 = vadd.f32 1e-05, %v336_v4 }
 0x108   : > { %v342_v10 = vadd.f32 1e-05, %v334_v5 }
 0x109   : > { %1042 = vrsqrt.f32 %v344_v9  ;;  %vm394_vm2 = vweird.f32 %v344_v9 }
 0x10a   : > { %1044 = vrsqrt.f32 %v342_v10  ;;  %vm374_vm6 = vweird.f32 %v342_v10 }
 0x10c   : > { %v331_v11 = vpop.xlane.xlu1 %330 }
 0x10d   : > { %v325_v14 = vpop.xlane.xlu2 %324  ;;  %v339_v15 = vmul.f32 %v331_v11, %v1184_v22  ;;  %v319_v16 = vpop.xlane.xlu0 %318 }
 0x10e   : > { %v337_v17 = vmul.f32 %v325_v14, %v1184_v22  ;;  %v335_v18 = vmul.f32 %v319_v16, %v1184_v22 }
 0x10f   : > { %v1043_v19 = vpop.eup %1042  ;;  %v347_v20 = vadd.f32 1e-05, %v339_v15 }
 0x110   : > { %v1045_v21 = vpop.eup %1044  ;;  %v389_v23 = vmul.f32 %v1043_v19, %v344_v9  ;;  %v345_v24 = vadd.f32 1e-05, %v337_v17  ;;  %v1247_v25 = vadd.f32 1e-05, %v335_v18  ;;  %vm395_vm3 = vweird.f32 %v1043_v19 }
 0x111   : > { %v369_v26 = vmul.f32 %v1045_v21, %v342_v10  ;;  %1046 = vrsqrt.f32 %v347_v20  ;;  %vm375_vm4 = vweird.f32 %v1045_v21  ;;  %vm1257_vm5 = vmor %vm394_vm2, %vm395_vm3  ;;  %vm424_vm7 = vweird.f32 %v347_v20 }
 0x112   : > { %v390_v27 = vmul.f32 %v1043_v19, %v389_v23  ;;  %1048 = vrsqrt.f32 %v345_v24  ;;  %vm376_vm8 = vmor %vm374_vm6, %vm375_vm4  ;;  %vm404_vm9 = vweird.f32 %v345_v24  ;;  %vm384_vm15 = vweird.f32 %v1247_v25 }
 0x113   : > { %v370_v30 = vmul.f32 %v1045_v21, %v369_v26  ;;  %1050 = vrsqrt.f32 %v1247_v25 }
 0x114   : > { %v391_v31 = vmul.f32 0.5, %v390_v27 }
 0x115   : > { %v371_v33 = vmul.f32 0.5, %v370_v30  ;;  %v310_v34 = vpop.xlane.xlu2 %309  ;;  %v328_v35 = vpop.xlane.xlu0 %327 }
 0x116   : > { %v392_v36 = vsub.f32 1.5, %v391_v31  ;;  %v332_v37 = vmul.f32 %v310_v34, %v1184_v22  ;;  %v338_v38 = vmul.f32 %v328_v35, %v1184_v22 }
 0x117   : > { %v1047_v39 = vpop.eup %1046  ;;  %v372_v40 = vsub.f32 1.5, %v371_v33 }
 0x118   : > { %v1049_v48 = vpop.eup %1048  ;;  %v393_v49 = vmul.f32 %v1043_v19, %v392_v36  ;;  %v419_v50 = vmul.f32 %v1047_v39, %v347_v20  ;;  %v1267_v51 = vadd.f32 1e-05, %v332_v37  ;;  %v1269_v55 = vadd.f32 1e-05, %v338_v38 }
 0x119   : > { %v1051_v52 = vpop.eup %1050  ;;  %v373_v53 = vmul.f32 %v1045_v21, %v372_v40  ;;  %v399_v54 = vmul.f32 %v1049_v48, %v345_v24  ;;  %vm425_vm10 = vweird.f32 %v1047_v39  ;;  %vm405_vm11 = vweird.f32 %v1049_v48 }
 0x11a   : > { %v397_v58 = vsel %vm1257_vm5, %v1043_v19, %v393_v49  ;;  %v420_v59 = vmul.f32 %v1047_v39, %v419_v50  ;;  %v379_v60 = vmul.f32 %v1051_v52, %v1247_v25  ;;  %1052 = vrsqrt.f32 %v1267_v51  ;;  %vm1282_vm12 = vmor %vm424_vm7, %vm425_vm10 }
 0x11b   : > { %v377_v61 = vsel %vm376_vm8, %v1045_v21, %v373_v53  ;;  %v432_v62 = vmul.f32 %v397_v58, %v1189_v28  ;;  %v400_v63 = vmul.f32 %v1049_v48, %v399_v54  ;;  %1054 = vrsqrt.f32 %v1269_v55  ;;  %vm1288_vm13 = vmor %vm404_vm9, %vm405_vm11 }
 0x11c   : > { %v430_v3 = vmul.f32 %v377_v61, %v1192_v29  ;;  %v421_v4 = vmul.f32 0.5, %v420_v59  ;;  %v380_v5 = vmul.f32 %v1051_v52, %v379_v60  ;;  %vm385_vm14 = vweird.f32 %v1051_v52 }
 0x11d   : > { %v401_v9 = vmul.f32 0.5, %v400_v63  ;;  %v313_v10 = vpop.xlane.xlu0 %312  ;;  %v441_v11 = vmul.f32 %v1262_v45, %v432_v62  ;;  %vm386_vm1 = vmor %vm384_vm15, %vm385_vm14  ;;  %vm354_vm2 = vweird.f32 %v1267_v51  ;;  %vm414_vm4 = vweird.f32 %v1269_v55 }
 0x11e   : > { %v422_v14 = vsub.f32 1.5, %v421_v4  ;;  %v381_v15 = vmul.f32 0.5, %v380_v5  ;;  %v333_v16 = vmul.f32 %v313_v10, %v1184_v22  ;;  %v439_v28 = vmul.f32 %v1262_v45, %v430_v3 }
 0x11f   : > { %v402_v17 = vsub.f32 1.5, %v401_v9  ;;  %v450_v18 = vadd.f32 %v1265_v47, %v441_v11 }
 0x120   : > { %v423_v21 = vmul.f32 %v1047_v39, %v422_v14  ;;  %v382_v23 = vsub.f32 1.5, %v381_v15  ;;  %v1292_v26 = vadd.f32 1e-05, %v333_v16  ;;  %v1053_v27 = vpop.eup %1052  ;;  %v448_v20 = vadd.f32 %v1265_v47, %v439_v28 }
 0x121   : > { %v403_v30 = vmul.f32 %v1049_v48, %v402_v17  ;;  %v1296_v31 = vadd.f32 %v450_v18, %v1154_v1  ;;  %v349_v34 = vmul.f32 %v1053_v27, %v1267_v51  ;;  %v1055_v35 = vpop.eup %1054  ;;  %vm355_vm3 = vweird.f32 %v1053_v27 }
 0x122   : > { %v427_v33 = vsel %vm1282_vm12, %v1047_v39, %v423_v21  ;;  %v383_v24 = vmul.f32 %v1051_v52, %v382_v23  ;;  %1056 = vrsqrt.f32 %v1292_v26  ;;  %v409_v40 = vmul.f32 %v1055_v35, %v1269_v55  ;;  %vm356_vm6 = vmor %vm354_vm2, %vm355_vm3 }
 0x123   : > { %v407_v36 = vsel %vm1288_vm13, %v1049_v48, %v403_v30  ;;  %v435_v37 = vmul.f32 %v427_v33, %v1205_v41  ;;  %v350_v39 = vmul.f32 %v1053_v27, %v349_v34  ;;  %v1311_v44 = vadd.f32 %v448_v20, %v1156_v2 }
 0x124   : > { %v433_v1 = vmul.f32 %v407_v36, %v1208_v42  ;;  %v387_v38 = vsel %vm386_vm1, %v1051_v52, %v383_v24  ;;  %v474_v41 = vsel %vm252_vm0, %v1296_v31, 0.0  ;;  %v410_v49 = vmul.f32 %v1055_v35, %v409_v40 }
 0x125   : > { %v431_v25 = vmul.f32 %v387_v38, %v1211_v43  ;;  %v351_v48 = vmul.f32 0.5, %v350_v39  ;;  %475 = vadd.xlane.f32.xlu0 %v474_v41  ;;  %v444_v42 = vmul.f32 %v1262_v45, %v435_v37  ;;  %vm415_vm5 = vweird.f32 %v1055_v35 }
 0x126   : > { %v442_v50 = vmul.f32 %v1262_v45, %v433_v1  ;;  %v468_v43 = vsel %vm252_vm0, %v1311_v44, 0.0  ;;  %v411_v53 = vmul.f32 0.5, %v410_v49  ;;  %vm1330_vm7 = vmor %vm414_vm4, %vm415_vm5  ;;  %vm364_vm8 = vweird.f32 %v1292_v26 }
 0x127   : > { %v440_v52 = vmul.f32 %v1262_v45, %v431_v25  ;;  %v352_v2 = vsub.f32 1.5, %v351_v48  ;;  %469 = vadd.xlane.f32.xlu1 %v468_v43  ;;  %v453_v58 = vadd.f32 %v1265_v47, %v444_v42 }
 0x128   : > { %v451_v54 = vadd.f32 %v1265_v47, %v442_v50  ;;  %v1057_v59 = vpop.eup %1056  ;;  %v412_v62 = vsub.f32 1.5, %v411_v53 }
 0x129   : > { %v449_v60 = vadd.f32 %v1265_v47, %v440_v52  ;;  %v353_v61 = vmul.f32 %v1053_v27, %v352_v2  ;;  %v359_v63 = vmul.f32 %v1057_v59, %v1292_v26  ;;  %v1338_v5 = vadd.f32 %v453_v58, %v1164_v6 }
 0x12a   : > { %v1335_v4 = vadd.f32 %v451_v54, %v1166_v7  ;;  %v413_v10 = vmul.f32 %v1055_v35, %v412_v62  ;;  %vm365_vm9 = vweird.f32 %v1057_v59 }
 0x12b   : > { %v1341_v51 = vadd.f32 %v449_v60, %v1168_v8  ;;  %v357_v9 = vsel %vm356_vm6, %v1053_v27, %v353_v61  ;;  %v360_v11 = vmul.f32 %v1057_v59, %v359_v63  ;;  %v483_v15 = vsel %vm252_vm0, %v1338_v5, 0.0  ;;  %vm366_vm10 = vmor %vm364_vm8, %vm365_vm9 }
 0x12c   : > { %v428_v14 = vmul.f32 %v357_v9, %v1230_v56  ;;  %v477_v55 = vsel %vm252_vm0, %v1335_v4, 0.0  ;;  %v417_v6 = vsel %vm1330_vm7, %v1055_v35, %v413_v10 }
 0x12d   : > { %v471_v7 = vsel %vm252_vm0, %v1341_v51, 0.0  ;;  %v361_v16 = vmul.f32 0.5, %v360_v11  ;;  %484 = vadd.xlane.f32.xlu0 %v483_v15  ;;  %v434_v8 = vmul.f32 %v417_v6, %v1218_v46 }
 0x12e   : > { %472 = vadd.xlane.f32.xlu2 %v471_v7  ;;  %v437_v56 = vmul.f32 %v1262_v45, %v428_v14 }
 0x12f   : > { %v362_v28 = vsub.f32 1.5, %v361_v16  ;;  %478 = vadd.xlane.f32.xlu1 %v477_v55  ;;  %v443_v29 = vmul.f32 %v1262_v45, %v434_v8 }
 0x130   : > { %v446_v17 = vadd.f32 %v1265_v47, %v437_v56 }
 0x131   : > { %v363_v18 = vmul.f32 %v1057_v59, %v362_v28  ;;  %v452_v21 = vadd.f32 %v1265_v47, %v443_v29  ;;  %v993_v29 = vld [vmem:[%s1595_s2 + $0x8] sm:$0xff] }
 0x132   : > { %v1358_v19 = vadd.f32 %v446_v17, %v1178_v13  ;;  %1002 = vmatpush.bf16.msra.mxu3 %v993_v29  ;;  %694 = vmatpush.bf16.msra.mxu0 %v993_v29 }
 0x133   : > { %v367_v23 = vsel %vm366_vm10, %v1057_v59, %v363_v18  ;;  %v1365_v27 = vadd.f32 %v452_v21, %v1152_v0 }
 0x134   : > { %v429_v26 = vmul.f32 %v367_v23, %v1233_v57  ;;  %v462_v46 = vsel %vm252_vm0, %v1358_v19, 0.0  ;;  %v992_v23 = vld [vmem:[%s1595_s2] sm:$0xff] }
 0x135   : > { %v480_v30 = vsel %vm252_vm0, %v1365_v27, 0.0 }
 0x136   : > { %v438_v20 = vmul.f32 %v1262_v45, %v429_v26  ;;  %481 = vadd.xlane.f32.xlu2 %v480_v30  ;;  %1003 = vmatpush.bf16.msra.mxu3 %v992_v23 }
 0x137   : > { %463 = vadd.xlane.f32.xlu1 %v462_v46  ;;  %695 = vmatpush.bf16.msra.mxu0 %v992_v23  ;;  %v1478_v23 = vperm.slane %v1253_v32, 3 }
 0x138   : > { %v447_v13 = vadd.f32 %v1265_v47, %v438_v20 }
 0x13a   : > { %v1372_v33 = vadd.f32 %v447_v13, %v1176_v12 }
 0x13c   : > { %v465_v57 = vsel %vm252_vm0, %v1372_v33, 0.0 }
 0x13e   : > { %466 = vadd.xlane.f32.xlu2 %v465_v57 }
 0x198   : > { %v476_v24 = vpop.xlane.xlu0 %475 }
 0x199   : > { %v490_v0 = vmul.f32 %v476_v24, %v1184_v22 }
 0x19a   : > { %v470_v34 = vpop.xlane.xlu1 %469 }
 0x19b   : > { %v488_v35 = vmul.f32 %v470_v34, %v1184_v22  ;;  %v1379_v36 = vsub.f32 %v1296_v31, %v490_v0 }
 0x19d   : > { %v1382_v45 = vsub.f32 %v1311_v44, %v488_v35  ;;  %v506_v12 = vmul.f32 %v1379_v36, %v1379_v36 }
 0x19f   : > { %v504_v47 = vmul.f32 %v1382_v45, %v1382_v45  ;;  %v522_v37 = vsel %vm252_vm0, %v506_v12, 0.0 }
 0x1a0   : > { %523 = vadd.xlane.f32.xlu2 %v522_v37  ;;  %v485_v38 = vpop.xlane.xlu0 %484 }
 0x1a1   : > { %v473_v1 = vpop.xlane.xlu2 %472  ;;  %v516_v39 = vsel %vm252_vm0, %v504_v47, 0.0  ;;  %v493_v25 = vmul.f32 %v485_v38, %v1184_v22 }
 0x1a2   : > { %v489_v40 = vmul.f32 %v473_v1, %v1184_v22  ;;  %v479_v41 = vpop.xlane.xlu1 %478  ;;  %517 = vadd.xlane.f32.xlu0 %v516_v39 }
 0x1a3   : > { %v491_v48 = vmul.f32 %v479_v41, %v1184_v22  ;;  %v1397_v50 = vsub.f32 %v1338_v5, %v493_v25 }
 0x1a4   : > { %v1394_v49 = vsub.f32 %v1341_v51, %v489_v40 }
 0x1a5   : > { %v1400_v42 = vsub.f32 %v1335_v4, %v491_v48  ;;  %v509_v52 = vmul.f32 %v1397_v50, %v1397_v50 }
 0x1a6   : > { %v505_v43 = vmul.f32 %v1394_v49, %v1394_v49 }
 0x1a7   : > { %v507_v2 = vmul.f32 %v1400_v42, %v1400_v42  ;;  %v531_v54 = vsel %vm252_vm0, %v509_v52, 0.0 }
 0x1a8   : > { %v519_v53 = vsel %vm252_vm0, %v505_v43, 0.0  ;;  %532 = vadd.xlane.f32.xlu2 %v531_v54 }
 0x1a9   : > { %520 = vadd.xlane.f32.xlu1 %v519_v53  ;;  %v525_v58 = vsel %vm252_vm0, %v507_v2, 0.0  ;;  %v482_v60 = vpop.xlane.xlu2 %481 }
 0x1aa   : > { %526 = vadd.xlane.f32.xlu0 %v525_v58  ;;  %v464_v59 = vpop.xlane.xlu1 %463  ;;  %v492_v62 = vmul.f32 %v482_v60, %v1184_v22 }
 0x1ab   : > { %v486_v61 = vmul.f32 %v464_v59, %v1184_v22 }
 0x1ac   : > { %v1417_v3 = vsub.f32 %v1365_v27, %v492_v62 }
 0x1ad   : > { %v1414_v63 = vsub.f32 %v1358_v19, %v486_v61 }
 0x1ae   : > { %v508_v10 = vmul.f32 %v1417_v3, %v1417_v3 }
 0x1af   : > { %v502_v9 = vmul.f32 %v1414_v63, %v1414_v63 }
 0x1b0   : > { %v528_v14 = vsel %vm252_vm0, %v508_v10, 0.0 }
 0x1b1   : > { %v510_v11 = vsel %vm252_vm0, %v502_v9, 0.0  ;;  %529 = vadd.xlane.f32.xlu1 %v528_v14  ;;  %v467_v55 = vpop.xlane.xlu2 %466 }
 0x1b2   : > { %511 = vadd.xlane.f32.xlu0 %v510_v11  ;;  %v487_v15 = vmul.f32 %v467_v55, %v1184_v22 }
 0x1b4   : > { %v1427_v7 = vsub.f32 %v1372_v33, %v487_v15  ;;  %v1470_v15 = vperm.slane %v1253_v32, 2 }
 0x1b6   : > { %v503_v6 = vmul.f32 %v1427_v7, %v1427_v7 }
 0x1b8   : > { %v513_v16 = vsel %vm252_vm0, %v503_v6, 0.0 }
 0x1b9   : > { %514 = vadd.xlane.f32.xlu1 %v513_v16 }
 0x213   : > { %v524_v8 = vpop.xlane.xlu2 %523 }
 0x214   : > { %v538_v56 = vmul.f32 %v524_v8, %v1184_v22 }
 0x215   : > { %v518_v28 = vpop.xlane.xlu0 %517 }
 0x216   : > { %v536_v17 = vmul.f32 %v518_v28, %v1184_v22  ;;  %v1437_v21 = vadd.f32 1e-05, %v538_v56 }
 0x218   : > { %v544_v18 = vadd.f32 1e-05, %v536_v17  ;;  %vm596_vm6 = vweird.f32 %v1437_v21 }
 0x21a   : > { %1058 = vrsqrt.f32 %v544_v18  ;;  %vm576_vm12 = vweird.f32 %v544_v18 }
 0x21b   : > { %1060 = vrsqrt.f32 %v1437_v21  ;;  %v533_v12 = vpop.xlane.xlu2 %532 }
 0x21c   : > { %v521_v26 = vpop.xlane.xlu1 %520  ;;  %v541_v40 = vmul.f32 %v533_v12, %v1184_v22 }
 0x21d   : > { %v537_v46 = vmul.f32 %v521_v26, %v1184_v22  ;;  %v527_v30 = vpop.xlane.xlu0 %526 }
 0x21e   : > { %v539_v13 = vmul.f32 %v527_v30, %v1184_v22  ;;  %v1464_v61 = vadd.f32 1e-05, %v541_v40 }
 0x21f   : > { %v545_v20 = vadd.f32 1e-05, %v537_v46 }
 0x220   : > { %v1059_v57 = vpop.eup %1058  ;;  %v1445_v24 = vadd.f32 1e-05, %v539_v13 }
 0x221   : > { %1062 = vrsqrt.f32 %v545_v20  ;;  %v571_v0 = vmul.f32 %v1059_v57, %v544_v18  ;;  %v1448_v34 = vpop.eup %1060  ;;  %vm577_vm11 = vweird.f32 %v1059_v57  ;;  %vm586_vm15 = vweird.f32 %v545_v20 }
 0x222   : > { %1064 = vrsqrt.f32 %v1445_v24  ;;  %v591_v39 = vmul.f32 %v1448_v34, %v1437_v21  ;;  %vm578_vm13 = vmor %vm576_vm12, %vm577_vm11  ;;  %vm597_vm3 = vweird.f32 %v1448_v34  ;;  %vm606_vm4 = vweird.f32 %v1445_v24  ;;  %v1001_v21 = vld [vmem:[%s1596_s3 + $0x38] sm:$0xff] }
 0x223   : > { %v572_v35 = vmul.f32 %v1059_v57, %v571_v0  ;;  %vm1505_vm7 = vmor %vm596_vm6, %vm597_vm3  ;;  %1004 = vmatpush.bf16.msra.mxu1 %v1001_v21  ;;  %821 = vmatpush.bf16.msrb.mxu0 %v1001_v21  ;;  %vm626_vm3 = vweird.f32 %v1464_v61 }
 0x224   : > { %v530_v37 = vpop.xlane.xlu1 %529  ;;  %v592_v60 = vmul.f32 %v1448_v34, %v591_v39  ;;  %1005 = vmatpush.bf16.msra.mxu2 %v1001_v21 }
 0x225   : > { %v573_v47 = vmul.f32 0.5, %v572_v35  ;;  %v512_v1 = vpop.xlane.xlu0 %511  ;;  %v540_v25 = vmul.f32 %v530_v37, %v1184_v22 }
 0x226   : > { %v534_v41 = vmul.f32 %v512_v1, %v1184_v22  ;;  %v593_v6 = vmul.f32 0.5, %v592_v60 }
 0x227   : > { %v1063_v38 = vpop.eup %1062  ;;  %v574_v48 = vsub.f32 1.5, %v573_v47  ;;  %v1457_v2 = vadd.f32 1e-05, %v540_v25 }
 0x228   : > { %v581_v43 = vmul.f32 %v1063_v38, %v545_v20  ;;  %v1455_v52 = vpop.eup %1064  ;;  %v1459_v53 = vadd.f32 1e-05, %v534_v41  ;;  %vm587_vm14 = vweird.f32 %v1063_v38  ;;  %v594_v46 = vsub.f32 1.5, %v593_v6 }
 0x229   : > { %v575_v54 = vmul.f32 %v1059_v57, %v574_v48  ;;  %v601_v59 = vmul.f32 %v1455_v52, %v1445_v24  ;;  %1066 = vrsqrt.f32 %v1457_v2  ;;  %vm588_vm1 = vmor %vm586_vm15, %vm587_vm14  ;;  %vm607_vm2 = vweird.f32 %v1455_v52 }
 0x22a   : > { %v582_v58 = vmul.f32 %v1063_v38, %v581_v43  ;;  %1068 = vrsqrt.f32 %v1459_v53  ;;  %vm1497_vm5 = vmor %vm606_vm4, %vm607_vm2  ;;  %vm556_vm9 = vweird.f32 %v1459_v53 }
 0x22b   : > { %v579_v62 = vsel %vm578_vm13, %v1059_v57, %v575_v54  ;;  %v602_v10 = vmul.f32 %v1455_v52, %v601_v59  ;;  %1070 = vrsqrt.f32 %v1464_v61 }
 0x22c   : > { %v583_v9 = vmul.f32 0.5, %v582_v58  ;;  %v515_v55 = vpop.xlane.xlu1 %514  ;;  %v632_v16 = vmul.f32 %v579_v62, %v1382_v45 }
 0x22d   : > { %v603_v14 = vmul.f32 0.5, %v602_v10  ;;  %v535_v8 = vmul.f32 %v515_v55, %v1184_v22  ;;  %v999_v55 = vld [vmem:[%s1596_s3 + $0x28] sm:$0xff] }
 0x22e   : > { %v584_v11 = vsub.f32 1.5, %v583_v9  ;;  %v641_v45 = vmul.f32 %v1470_v15, %v632_v16 }
 0x22f   : > { %v604_v28 = vsub.f32 1.5, %v603_v14  ;;  %v543_v17 = vadd.f32 1e-05, %v535_v8  ;;  %v1475_v29 = vpop.eup %1066 }
 0x230   : > { %v585_v56 = vmul.f32 %v1063_v38, %v584_v11  ;;  %v1069_v26 = vpop.eup %1068  ;;  %v611_v32 = vmul.f32 %v1475_v29, %v1457_v2  ;;  %v650_v35 = vadd.f32 %v1478_v23, %v641_v45  ;;  %vm617_vm14 = vweird.f32 %v1475_v29 }
 0x231   : > { %1072 = vrsqrt.f32 %v543_v17  ;;  %v551_v22 = vmul.f32 %v1069_v26, %v1459_v53  ;;  %v1483_v13 = vpop.eup %1070  ;;  %v605_v20 = vmul.f32 %v1455_v52, %v604_v28  ;;  %vm557_vm8 = vweird.f32 %v1069_v26 }
 0x232   : > { %v589_v18 = vsel %vm588_vm1, %v1063_v38, %v585_v56  ;;  %v621_v47 = vmul.f32 %v1483_v13, %v1464_v61  ;;  %v612_v25 = vmul.f32 %v1475_v29, %v611_v32  ;;  %vm558_vm10 = vmor %vm556_vm9, %vm557_vm8  ;;  %vm566_vm12 = vweird.f32 %v543_v17 }
 0x233   : > { %v633_v30 = vmul.f32 %v589_v18, %v1394_v49  ;;  %v552_v0 = vmul.f32 %v1069_v26, %v551_v22  ;;  %v595_v49 = vmul.f32 %v1448_v34, %v594_v46  ;;  %v609_v39 = vsel %vm1497_vm5, %v1455_v52, %v605_v20 }
 0x234   : > { %v622_v52 = vmul.f32 %v1483_v13, %v621_v47  ;;  %v635_v59 = vmul.f32 %v609_v39, %v1400_v42  ;;  %v613_v60 = vmul.f32 0.5, %v612_v25  ;;  %vm627_vm15 = vweird.f32 %v1483_v13 }
 0x235   : > { %v642_v57 = vmul.f32 %v1470_v15, %v633_v30  ;;  %v553_v1 = vmul.f32 0.5, %v552_v0  ;;  %v599_v43 = vsel %vm1505_vm7, %v1448_v34, %v595_v49  ;;  %v1000_v34 = vld [vmem:[%s1596_s3 + $0x30] sm:$0xff]  ;;  %vm616_vm1 = vweird.f32 %v1457_v2  ;;  %vm628_vm4 = vmor %vm626_vm3, %vm627_vm15 }
 0x236   : > { %v634_v10 = vmul.f32 %v599_v43, %v1379_v36  ;;  %v623_v11 = vmul.f32 0.5, %v622_v52  ;;  %v644_v42 = vmul.f32 %v1470_v15, %v635_v59  ;;  %1006 = vmatpush.bf16.msra.mxu1 %v1000_v34  ;;  %822 = vmatpush.bf16.msrb.mxu0 %v1000_v34  ;;  %v614_v6 = vsub.f32 1.5, %v613_v60  ;;  %vm618_vm2 = vmor %vm616_vm1, %vm617_vm14 }
 0x237   : > { %v651_v12 = vadd.f32 %v1478_v23, %v642_v57  ;;  %v1073_v38 = vpop.eup %1072  ;;  %v554_v41 = vsub.f32 1.5, %v553_v1  ;;  %1007 = vmatpush.bf16.msra.mxu2 %v1000_v34 }
 0x238   : > { %v561_v48 = vmul.f32 %v1073_v38, %v543_v17  ;;  %vm567_vm11 = vweird.f32 %v1073_v38  ;;  %v643_v36 = vmul.f32 %v1470_v15, %v634_v10  ;;  %v624_v8 = vsub.f32 1.5, %v623_v11 }
 0x239   : > { %v657_v24 = vpack.c.bf16 %v651_v12, %v650_v35  ;;  %v555_v54 = vmul.f32 %v1069_v26, %v554_v41  ;;  %vm568_vm13 = vmor %vm566_vm12, %vm567_vm11  ;;  %v653_v18 = vadd.f32 %v1478_v23, %v644_v42 }
 0x23a   : > { %v562_v58 = vmul.f32 %v1073_v38, %v561_v48  ;;  %1008 = vmatpush.bf16.msra.mxu1 %v999_v55  ;;  %823 = vmatpush.bf16.msrb.mxu0 %v999_v55  ;;  %v652_v46 = vadd.f32 %v1478_v23, %v643_v36  ;;  %v625_v30 = vmul.f32 %v1483_v13, %v624_v8  ;;  %v744_v48 = vstv %s957_s30 }
 0x23b   : > { %954 = vmatmul.msk.bf16.vlgmr.msra.gmra.mxu3 %vm252_vm0, %v657_v24  ;;  %v559_v62 = vsel %vm558_vm10, %v1069_v26, %v555_v54  ;;  %v615_v26 = vmul.f32 %v1475_v29, %v614_v6  ;;  %1009 = vmatpush.bf16.msra.mxu2 %v999_v55 }
 0x23c   : > { %v563_v9 = vmul.f32 0.5, %v562_v58  ;;  %v630_v53 = vmul.f32 %v559_v62, %v1414_v63  ;;  %v658_v22 = vpack.c.bf16 %v653_v18, %v652_v46  ;;  %v629_v32 = vsel %vm628_vm4, %v1483_v13, %v625_v30  ;;  %v998_v13 = vld [vmem:[%s1596_s3 + $0x20] sm:$0xff] }
 0x23d   : > { %v619_v20 = vsel %vm618_vm2, %v1475_v29, %v615_v26  ;;  %v637_v2 = vmul.f32 %v629_v32, %v1397_v50  ;;  %v997_v50 = vld [vmem:[%s1596_s3 + $0x18] sm:$0xff] }
 0x23e   : > { %v564_v14 = vsub.f32 1.5, %v563_v9  ;;  %v639_v63 = vmul.f32 %v1470_v15, %v630_v53  ;;  %v636_v0 = vmul.f32 %v619_v20, %v1417_v3  ;;  %1010 = vmatpush.bf16.msra.mxu1 %v998_v13  ;;  %824 = vmatpush.bf16.msrb.mxu0 %v998_v13  ;;  %v996_v3 = vld [vmem:[%s1596_s3 + $0x10] sm:$0xff] }
 0x23f   : > { %v646_v35 = vmul.f32 %v1470_v15, %v637_v2  ;;  %1011 = vmatpush.bf16.msra.mxu2 %v998_v13 }
 0x240   : > { %v565_v16 = vmul.f32 %v1073_v38, %v564_v14  ;;  %v645_v49 = vmul.f32 %v1470_v15, %v636_v0 }
 0x241   : > { %v655_v29 = vadd.f32 %v1478_v23, %v646_v35 }
 0x242   : > { %v569_v56 = vsel %vm568_vm13, %v1073_v38, %v565_v16  ;;  %v654_v61 = vadd.f32 %v1478_v23, %v645_v49  ;;  %1012 = vmatpush.bf16.msra.mxu1 %v997_v50  ;;  %825 = vmatpush.bf16.msrb.mxu0 %v997_v50  ;;  %v734_v38 = vstv %s725_s29 }
 0x243   : > { %v631_v28 = vmul.f32 %v569_v56, %v1427_v7  ;;  %v648_v7 = vadd.f32 %v1478_v23, %v639_v63  ;;  %1013 = vmatpush.bf16.msra.mxu2 %v997_v50 }
 0x244   : > { %v659_v12 = vpack.c.bf16 %v655_v29, %v654_v61 }
 0x245   : > { %v640_v17 = vmul.f32 %v1470_v15, %v631_v28  ;;  %v995_v15 = vld [vmem:[%s1596_s3 + $0x8] sm:$0xff] }
 0x246   : > { %1014 = vmatpush.bf16.msra.mxu1 %v996_v3  ;;  %826 = vmatpush.bf16.msrb.mxu0 %v996_v3 }
 0x247   : > { %v649_v45 = vadd.f32 %v1478_v23, %v640_v17  ;;  %1015 = vmatpush.bf16.msra.mxu2 %v996_v3  ;;  %v994_v23 = vld [vmem:[%s1596_s3] sm:$0xff] }
 0x249   : > { %v656_v57 = vpack.c.bf16 %v649_v45, %v648_v7 }
 0x24a   : > { %1016 = vmatpush.bf16.msra.mxu1 %v995_v15  ;;  %827 = vmatpush.bf16.msrb.mxu0 %v995_v15 }
 0x24b   : > { %955 = vmatmul.msk.bf16.gmra.mxu3 %vm252_vm0, %v658_v22  ;;  %953 = vmatmul.msk.bf16.vlgmr.msra.gmra.mxu0 %vm252_vm0, %v656_v57 }
 0x24c   : > { %1017 = vmatpush.bf16.msra.mxu2 %v995_v15 }
 0x24e   : > { %1018 = vmatpush.bf16.msra.mxu1 %v994_v23  ;;  %828 = vmatpush.bf16.msrb.mxu0 %v994_v23 }
 0x250   : > { %1019 = vmatpush.bf16.msra.mxu2 %v994_v23 }
 0x25b   : > { %956 = vmatmul.msk.bf16.gmra.mxu3 %vm252_vm0, %v659_v12 }
 0x2be   : > { %v702_v47 = vpop.f32.mrf.mxu3 }
 0x2bf   : > { %v719_v37 = vmax.f32 %v702_v47, 0.0 }
 0x2c1   : > { %v728_v1 = vmul.f32 %v719_v37, %v719_v37 }
 0x2c3   : > { %v737_v40 = vmul.f32 %v734_v38, %v728_v1 }
 0x2c5   : > { %v747_v52 = vadd.f32 %v744_v48, %v737_v40 }
 0x2c6   : > { %v704_v39 = vpop.f32.mrf.mxu3 }
 0x2c7   : > { %v720_v24 = vmax.f32 %v704_v39, 0.0 }
 0x2c8   : > { %v697_v41 = vpop.f32.mrf.mxu0 }
 0x2c9   : > { %v729_v25 = vmul.f32 %v720_v24, %v720_v24  ;;  %v717_v21 = vmax.f32 %v697_v41, 0.0 }
 0x2cb   : > { %v738_v43 = vmul.f32 %v734_v38, %v729_v25  ;;  %v726_v34 = vmul.f32 %v717_v21, %v717_v21 }
 0x2cd   : > { %v748_v54 = vadd.f32 %v744_v48, %v738_v43  ;;  %v735_v10 = vmul.f32 %v734_v38, %v726_v34 }
 0x2ce   : > { %v707_v58 = vpop.f32.mrf.mxu3 }
 0x2cf   : > { %v754_v59 = vpack.c.bf16 %v748_v54, %v747_v52  ;;  %v721_v60 = vmax.f32 %v707_v58, 0.0  ;;  %v745_v6 = vadd.f32 %v744_v48, %v735_v10 }
 0x2d0   : > { %v699_v62 = vpop.f32.mrf.mxu0 }
 0x2d1   : > { %834 = vmatmul.bf16.vlgmr.msra.gmra.mxu1 %v754_v59  ;;  %v718_v9 = vmax.f32 %v699_v62, 0.0  ;;  %v730_v11 = vmul.f32 %v721_v60, %v721_v60 }
 0x2d3   : > { %v727_v14 = vmul.f32 %v718_v9, %v718_v9  ;;  %v739_v16 = vmul.f32 %v734_v38, %v730_v11 }
 0x2d5   : > { %v736_v42 = vmul.f32 %v734_v38, %v727_v14  ;;  %v749_v63 = vadd.f32 %v744_v48, %v739_v16 }
 0x2d6   : > { %v709_v53 = vpop.f32.mrf.mxu3 }
 0x2d7   : > { %v722_v55 = vmax.f32 %v709_v53, 0.0  ;;  %v746_v36 = vadd.f32 %v744_v48, %v736_v42 }
 0x2d9   : > { %v731_v8 = vmul.f32 %v722_v55, %v722_v55  ;;  %v753_v28 = vpack.c.bf16 %v746_v36, %v745_v6 }
 0x2db   : > { %v740_v56 = vmul.f32 %v734_v38, %v731_v8  ;;  %829 = vmatmul.bf16.vlgmr.msrb.gmra.mxu0 %v753_v28 }
 0x2dd   : > { %v750_v18 = vadd.f32 %v744_v48, %v740_v56 }
 0x2de   : > { %v712_v26 = vpop.f32.mrf.mxu3 }
 0x2df   : > { %v755_v17 = vpack.c.bf16 %v750_v18, %v749_v63  ;;  %v723_v46 = vmax.f32 %v712_v26, 0.0 }
 0x2e1   : > { %839 = vmatmul.bf16.vlgmr.msra.gmra.mxu2 %v755_v17  ;;  %v732_v30 = vmul.f32 %v723_v46, %v723_v46 }
 0x2e3   : > { %v741_v22 = vmul.f32 %v734_v38, %v732_v30 }
 0x2e5   : > { %v751_v32 = vadd.f32 %v744_v48, %v741_v22 }
 0x2e6   : > { %v714_v7 = vpop.f32.mrf.mxu3 }
 0x2e7   : > { %v724_v45 = vmax.f32 %v714_v7, 0.0 }
 0x2e9   : > { %v733_v20 = vmul.f32 %v724_v45, %v724_v45 }
 0x2eb   : > { %v742_v57 = vmul.f32 %v734_v38, %v733_v20 }
 0x2ed   : > { %v752_v0 = vadd.f32 %v744_v48, %v742_v57 }
 0x2ef   : > { %v756_v2 = vpack.c.bf16 %v752_v0, %v751_v32 }
 0x2f1   : > { %844 = vmatmul.bf16.gmra.mxu2 %v756_v2 }
 0x34e   : > { %v835_v49 = vpop.f32.mrf.mxu1 }
 0x34f   : > { %v852_v35 = vadd.f32 %v835_v49, %v1311_v44 }
 0x351   : > { %860 = vst.msk [vmem:[%s240_s8 + $0x10] sm:$0xff] %vm252_vm0, %v852_v35 }
 0x356   : > { %v837_v61 = vpop.f32.mrf.mxu1 }
 0x357   : > { %v853_v29 = vadd.f32 %v837_v61, %v1341_v51 }
 0x358   : > { %v830_v12 = vpop.f32.mrf.mxu0 }
 0x359   : > { %861 = vst.msk [vmem:[%s240_s8 + $0x18] sm:$0xff] %vm252_vm0, %v853_v29  ;;  %v850_v13 = vadd.f32 %v830_v12, %v1358_v19 }
 0x35b   : > { %858 = vst.msk [vmem:[%s240_s8] sm:$0xff] %vm252_vm0, %v850_v13 }
 0x360   : > { %v832_v50 = vpop.f32.mrf.mxu0 }
 0x361   : > { %v851_v3 = vadd.f32 %v832_v50, %v1372_v33 }
 0x363   : > { %859 = vst.msk [vmem:[%s240_s8 + $0x8] sm:$0xff] %vm252_vm0, %v851_v3 }
 0x364   : > { %v840_v15 = vpop.f32.mrf.mxu2 }
 0x365   : > { %v854_v44 = vadd.f32 %v840_v15, %v1296_v31 }
 0x367   : > { %862 = vst.msk [vmem:[%s240_s8 + $0x20] sm:$0xff] %vm252_vm0, %v854_v44 }
 0x36c   : > { %v842_v23 = vpop.f32.mrf.mxu2 }
 0x36d   : > { %v855_v51 = vadd.f32 %v842_v23, %v1335_v4 }
 0x36f   : > { %863 = vst.msk [vmem:[%s240_s8 + $0x28] sm:$0xff] %vm252_vm0, %v855_v51 }
 0x374   : > { %v845_v47 = vpop.f32.mrf.mxu2 }
 0x375   : > { %v856_v19 = vadd.f32 %v845_v47, %v1365_v27 }
 0x377   : > { %864 = vst.msk [vmem:[%s240_s8 + $0x30] sm:$0xff] %vm252_vm0, %v856_v19 }
 0x37c   : > { %v847_v37 = vpop.f32.mrf.mxu2 }
 0x37d   : > { %v857_v33 = vadd.f32 %v847_v37, %v1338_v5 }
 0x37f   : > { %865 = vst.msk [vmem:[%s240_s8 + $0x38] sm:$0xff] %vm252_vm0, %v857_v33 }
 0x380 PF: > { %s16_s18 = sadd.s32 1, %s1099_s18  }
 0x381   : > { %p13_p7 = scmp.ge.s32.totalorder %s16_s18, 4  }
 0x383   :  { %15 = sbr.rel (!%p13_p7) target bundleno = 1 (0x1), region = 75 }
 0x388   :  { %888 = vsyncpa [#allocation3], 1 }
 0x389   :  { %890 = vsyncpa [#allocation3 + $0x1], 1 }

</bundles_post_ra>
